<compile_context>
chip_gen: v7x
topology: tpu7x:2x2x1
jax: 0.10.0
libtpu: 0.0.40
codegen_flags: <defaults>
</compile_context>

<pallas_src>
import jax
import jax.numpy as jnp
from jax.experimental import pallas as pl
from jax.experimental.pallas import tpu as pltpu


_ROW_CAP = 16384  # logical rows per tile (packed rows R = _ROW_CAP / P)


def _round_up(x, m):
    return ((x + m - 1) // m) * m


def _num_tensorcores_per_chip():
    """Best-effort chip detection: v7x has 2 TCs/chip, v5e/v6e have 1."""
    try:
        kind = jax.devices()[0].device_kind.lower()
        if "v7" in kind or "7x" in kind:
            return 2
    except Exception:
        pass
    return 1


def _item_context_kernel(ids_ref, ctx_ref, e_blk_ref, c_blk_ref, b_ref, out_ref):
    """One row tile.

    ids_ref:   [R, P]      int32  P item ids per packed row, PRE-OFFSET by slot*V
                                  (out-of-range ids replaced by -1 in the wrapper)
    ctx_ref:   [R, P*C]    bf16   P context rows packed per 128-lane row
    e_blk_ref: [P*V, P*H]  bf16   kron(I_P, emb @ Wj1^T)   (block-diag fused table)
    c_blk_ref: [P*C, P*H]  bf16   kron(I_P, Wc^T @ Wj2^T)  (block-diag fused weight)
    b_ref:     [1, P*H]    f32    fused bias tiled P times
    out_ref:   [R, P*H]    f32    P output rows packed per 128-lane row
    """
    ids = ids_ref[...]                       # [R, P] int32 (pre-offset)
    R, P = ids.shape
    PV = e_blk_ref.shape[0]                  # P * V

    # Context contribution: single lane-dense bf16 MXU pass, f32 accumulate.
    acc = jnp.dot(ctx_ref[...], c_blk_ref[...],
                  preferred_element_type=jnp.float32)          # [R, P*H] f32

    # Embedding lookup: ONE K = P*V matmul against the block-diag fused table.
    # ids are pre-offset by slot*V, so the P per-slot one-hots occupy disjoint
    # column ranges of a single [R, P*V] one-hot (no per-slot dot chain).
    col = jax.lax.broadcasted_iota(jnp.int32, (R, PV), 1)
    onehot = jnp.zeros((R, PV), dtype=jnp.float32)
    for j in range(P):                       # static unroll, P <= 4 (VPU compares)
        onehot += (ids[:, j:j + 1] == col).astype(jnp.float32)
    acc += jnp.dot(onehot.astype(e_blk_ref.dtype), e_blk_ref[...],
                   preferred_element_type=jnp.float32)

    out_ref[...] = acc + b_ref[...]


def prepare_fused_params(params):
    """One-time weight prep (hoisted out of the per-call path)."""
    hi = jax.lax.Precision.HIGHEST
    emb = params["item_emb"].astype(jnp.float32)    # [V, H]
    wc = params["context_w"].astype(jnp.float32)    # [H, C] (torch Linear layout)
    bc = params["context_b"].astype(jnp.float32)    # [H]
    wj = params["joint_w"].astype(jnp.float32)      # [H, 2H]
    bj = params["joint_b"].astype(jnp.float32)      # [H]
    V, H = emb.shape
    C = wc.shape[1]

    wj1 = wj[:, :H].T                                # acts on item_emb
    wj2 = wj[:, H:].T                                # acts on context_emb
    e_f = jnp.dot(emb, wj1, precision=hi)            # [V, H]
    c_f = jnp.dot(wc.T, wj2, precision=hi)           # [C, H]
    b_f = jnp.dot(bc, wj2, precision=hi) + bj        # [H]

    # Pack factor: P logical output rows per 128-lane row (fully dense stores).
    # If H does not divide 128, P falls back to 1 (correct, but masked stores).
    P = 128 // H if (H <= 128 and 128 % H == 0) else 1
    eye = jnp.eye(P, dtype=jnp.float32)
    # bf16 weights: halves HBM/VMEM bytes; MXU is natively bf16 on v5e/v6e/v7x.
    return {
        "e_blk": jnp.kron(eye, e_f).astype(jnp.bfloat16),    # [P*V, P*H]
        "c_blk": jnp.kron(eye, c_f).astype(jnp.bfloat16),    # [P*C, P*H]
        "b_blk": jnp.tile(b_f, (P,)).reshape(1, P * H),      # [1, P*H] f32
        "V": V, "H": H, "C": C, "P": P,
    }


def _default_row_tile(N, row_align, n_tc):
    if n_tc >= 2:
        # v7x: even number of "parallel" grid steps so both TensorCores stay busy.
        steps = max(2, 2 * pl.cdiv(N, 2 * _ROW_CAP))
        return _round_up(pl.cdiv(N, steps), row_align)
    # v5e / v6e: the grid is a sequential loop on one TC — one maximal tile when
    # N fits under the cap, else cap-sized tiles (per-step overhead ~0.35 us).
    return min(_ROW_CAP, _round_up(N, row_align))


def _vmem_estimate_bytes(R, P, C, H, V):
    """Double-buffered VMEM footprint of all tiles (padded to (8,128))."""
    lane = lambda n: _round_up(n, 128)
    sub = lambda n: _round_up(max(n, 1), 8)
    ids_t = sub(R) * lane(P) * 4          # int32, lane-padded to 128
    ctx_t = sub(R) * lane(P * C) * 2      # bf16
    out_t = sub(R) * lane(P * H) * 4      # f32
    e_t = sub(P * V) * lane(P * H) * 2    # bf16
    c_t = sub(P * C) * lane(P * H) * 2    # bf16
    b_t = sub(1) * lane(P * H) * 4        # f32
    return 2 * (ids_t + ctx_t + out_t + e_t + c_t + b_t)


def item_context_processor(item_ids, context_features, params, *, row_tile=None):
    """item_ids: [B, S] int; context_features: [B, S, C] -> [B, S, H] f32."""
    fused = params if "e_blk" in params else prepare_fused_params(params)
    V, H, C, P = fused["V"], fused["H"], fused["C"], fused["P"]

    B, S = item_ids.shape
    assert context_features.shape == (B, S, C)
    N = B * S

    row_align = 8 * P  # packed rows must be a multiple of 8 sublanes
    if row_tile is None:
        tn = _default_row_tile(N, row_align, _num_tensorcores_per_chip())
    else:
        tn = row_tile
    tn = max(row_align, _round_up(tn, row_align))
    n_pad = _round_up(N, tn)
    grid = (n_pad // tn,)
    R = tn // P

    ids_flat = item_ids.reshape(N).astype(jnp.int32)
    ctx_flat = context_features.reshape(N, C).astype(jnp.bfloat16)  # bf16 HBM stream
    if n_pad != N:
        ids_flat = jnp.pad(ids_flat, (0, n_pad - N))
        ctx_flat = jnp.pad(ctx_flat, ((0, n_pad - N), (0, 0)))

    # Free (row-major-identical) reshapes into lane-packed layouts.
    ids_p = ids_flat.reshape(n_pad // P, P)           # [Np/P, P]
    ctx_p = ctx_flat.reshape(n_pad // P, P * C)       # [Np/P, P*C]

    # Pre-offset ids by slot*V so the kernel builds one [R, P*V] one-hot and
    # does a single K = P*V matmul.  Out-of-range ids -> -1 (never match -> 0).
    slot_off = (jnp.arange(P, dtype=jnp.int32) * V)[None, :]
    ids_p = jnp.where((ids_p >= 0) & (ids_p < V), ids_p + slot_off, -1)

    vmem_limit = int(min(_vmem_estimate_bytes(R, P, C, H, V) + (4 << 20), 64 << 20))

    out_p = pl.pallas_call(
        _item_context_kernel,
        out_shape=jax.ShapeDtypeStruct((n_pad // P, P * H), jnp.float32),
        grid_spec=pltpu.PrefetchScalarGridSpec(
            num_scalar_prefetch=0,
            grid=grid,
            in_specs=[
                # ids tile is only P lanes wide (padded to 128 in VMEM); minor
                # cost — ctx/out streams dominate HBM bytes.
                pl.BlockSpec((R, P), lambda i: (i, 0)),          # packed, offset ids
                pl.BlockSpec((R, P * C), lambda i: (i, 0)),      # packed ctx (bf16)
                pl.BlockSpec((P * V, P * H), lambda i: (0, 0)),  # fused emb (blockdiag)
                pl.BlockSpec((P * C, P * H), lambda i: (0, 0)),  # fused ctx W (blockdiag)
                pl.BlockSpec((1, P * H), lambda i: (0, 0)),      # fused bias
            ],
            out_specs=pl.BlockSpec((R, P * H), lambda i: (i, 0)),
        ),
        compiler_params=pltpu.CompilerParams(
            dimension_semantics=("parallel",),
            vmem_limit_bytes=vmem_limit),
    )(ids_p, ctx_p, fused["e_blk"], fused["c_blk"], fused["b_blk"])

    # Free reshape back: (Np/P, P*H) row-major == (Np, H) row-major.
    return out_p.reshape(n_pad, H)[:N].reshape(B, S, H)


def init_params(key, item_vocab_size, hidden_size, context_size):
    """Deterministic init matching the module's shapes (std=0.01 normals)."""
    k1, k2, k3, k4, k5 = jax.random.split(key, 5)
    V = item_vocab_size + 1
    # NOTE: nn.init.normal_ overwrites the padding row, so forward does NOT
    # zero row 0 — we replicate that by not zeroing it either.
    return {
        "item_emb":  0.01 * jax.random.normal(k1, (V, hidden_size), jnp.float32),
        "context_w": 0.01 * jax.random.normal(k2, (hidden_size, context_size), jnp.float32),
        "context_b": 0.01 * jax.random.normal(k3, (hidden_size,), jnp.float32),
        "joint_w":   0.01 * jax.random.normal(k4, (hidden_size, 2 * hidden_size), jnp.float32),
        "joint_b":   0.01 * jax.random.normal(k5, (hidden_size,), jnp.float32),
    }


def _reference(item_ids, context_features, p):
    hi = jax.lax.Precision.HIGHEST
    item_emb = p["item_emb"][item_ids]                                       # [B,S,H]
    ctx_emb = jnp.dot(context_features, p["context_w"].T, precision=hi) + p["context_b"]
    joint = jnp.concatenate([item_emb, ctx_emb], axis=-1)                    # [B,S,2H]
    return jnp.dot(joint, p["joint_w"].T, precision=hi) + p["joint_b"]       # [B,S,H]


if __name__ == "__main__":
    item_vocab_size = 63   # table has 64 rows
    hidden_size = 32
    context_size = 16
    B, S = 2, 8

    key = jax.random.PRNGKey(0)
    kp, ki, kc = jax.random.split(key, 3)
    params = init_params(kp, item_vocab_size, hidden_size, context_size)

    item_ids = jax.random.randint(ki, (B, S), 0, item_vocab_size + 1, dtype=jnp.int32)
    context_features = jax.random.normal(kc, (B, S, context_size), jnp.float32)

    # Hoist weight prep out of the per-call path (precompute once, reuse).
    fused = prepare_fused_params(params)
    fused = jax.tree_util.tree_map(
        lambda x: jax.block_until_ready(x) if isinstance(x, jax.Array) else x, fused)

    out = item_context_processor(item_ids, context_features, fused)
    out = jax.block_until_ready(out)

    ref = _reference(item_ids, context_features, params)
    assert out.shape == (B, S, hidden_size)
    # Weight fusion reorders f32 accumulation and bf16 input/weight streams add
    # ~0.4% relative rounding; tolerance reflects that.
    err = float(jnp.abs(out - ref).max())
    assert jnp.allclose(out, ref, atol=2e-3, rtol=2e-2), err

    print("KERNEL_OK")
</pallas_src>

<mosaic_0001>
module attributes {stable_mosaic.version = 11 : i64} {
  func.func @_item_context_kernel(%arg0: i32, %arg1: memref<8x4xi32, #tpu.memory_space<vmem>>, %arg2: memref<8x64xbf16, #tpu.memory_space<vmem>>, %arg3: memref<256x128xbf16, #tpu.memory_space<vmem>>, %arg4: memref<64x128xbf16, #tpu.memory_space<vmem>>, %arg5: memref<1x128xf32, #tpu.memory_space<vmem>>, %arg6: memref<8x128xf32, #tpu.memory_space<vmem>>) attributes {dimension_semantics = [#tpu.dimension_semantics<parallel>], iteration_bounds = array<i64: 1>, scalar_prefetch = 0 : i64, scratch_operands = 0 : i64, tpu.core_type = #tpu.core_type<tc>, window_params = [{transform_indices = @transform_0, window_bounds = array<i64: 8, 4>}, {transform_indices = @transform_1, window_bounds = array<i64: 8, 64>}, {pipeline_mode = #tpu.pipeline_mode<synchronous>, transform_indices = @transform_2, window_bounds = array<i64: 256, 128>}, {pipeline_mode = #tpu.pipeline_mode<synchronous>, transform_indices = @transform_3, window_bounds = array<i64: 64, 128>}, {pipeline_mode = #tpu.pipeline_mode<synchronous>, transform_indices = @transform_4, window_bounds = array<i64: 1, 128>}, {transform_indices = @transform_5, window_bounds = array<i64: 8, 128>}]} {
    %c0 = arith.constant 0 : index
    %c0_0 = arith.constant 0 : index
    %0 = vector.load %arg1[%c0, %c0_0] : memref<8x4xi32, #tpu.memory_space<vmem>>, vector<8x4xi32>
    %c0_1 = arith.constant 0 : index
    %c0_2 = arith.constant 0 : index
    %1 = vector.load %arg2[%c0_1, %c0_2] : memref<8x64xbf16, #tpu.memory_space<vmem>>, vector<8x64xbf16>
    %c0_3 = arith.constant 0 : index
    %c0_4 = arith.constant 0 : index
    %2 = vector.load %arg4[%c0_3, %c0_4] : memref<64x128xbf16, #tpu.memory_space<vmem>>, vector<64x128xbf16>
    %cst = arith.constant dense<0.000000e+00> : vector<8x128xf32>
    %3 = tpu.matmul %1, %2, %cst {dimension_numbers = #tpu.dot_dimension_numbers<[1], [0], [0], [1], [0, 0, 1, 1], [], []>} : vector<8x64xbf16>, vector<64x128xbf16>, vector<8x128xf32> -> vector<8x128xf32>
    %4 = tpu.iota {dimensions = array<i32: 1>} : vector<8x256xi32>
    %cst_5 = arith.constant 0.000000e+00 : f32
    %5 = vector.broadcast %cst_5 : f32 to vector<8x256xf32>
    %6 = vector.extract_strided_slice %0 {offsets = [0, 0], sizes = [8, 1], strides = [1, 1]} : vector<8x4xi32> to vector<8x1xi32>
    %7 = vector.broadcast %6 : vector<8x1xi32> to vector<8x256xi32>
    %8 = arith.cmpi eq, %7, %4 : vector<8x256xi32>
    %9 = arith.extui %8 : vector<8x256xi1> to vector<8x256xi32>
    %10 = arith.sitofp %9 : vector<8x256xi32> to vector<8x256xf32>
    %11 = arith.addf %5, %10 : vector<8x256xf32>
    %12 = vector.extract_strided_slice %0 {offsets = [0, 1], sizes = [8, 1], strides = [1, 1]} : vector<8x4xi32> to vector<8x1xi32>
    %13 = vector.broadcast %12 : vector<8x1xi32> to vector<8x256xi32>
    %14 = arith.cmpi eq, %13, %4 : vector<8x256xi32>
    %15 = arith.extui %14 : vector<8x256xi1> to vector<8x256xi32>
    %16 = arith.sitofp %15 : vector<8x256xi32> to vector<8x256xf32>
    %17 = arith.addf %11, %16 : vector<8x256xf32>
    %18 = vector.extract_strided_slice %0 {offsets = [0, 2], sizes = [8, 1], strides = [1, 1]} : vector<8x4xi32> to vector<8x1xi32>
    %19 = vector.broadcast %18 : vector<8x1xi32> to vector<8x256xi32>
    %20 = arith.cmpi eq, %19, %4 : vector<8x256xi32>
    %21 = arith.extui %20 : vector<8x256xi1> to vector<8x256xi32>
    %22 = arith.sitofp %21 : vector<8x256xi32> to vector<8x256xf32>
    %23 = arith.addf %17, %22 : vector<8x256xf32>
    %24 = vector.extract_strided_slice %0 {offsets = [0, 3], sizes = [8, 1], strides = [1, 1]} : vector<8x4xi32> to vector<8x1xi32>
    %25 = vector.broadcast %24 : vector<8x1xi32> to vector<8x256xi32>
    %26 = arith.cmpi eq, %25, %4 : vector<8x256xi32>
    %27 = arith.extui %26 : vector<8x256xi1> to vector<8x256xi32>
    %28 = arith.sitofp %27 : vector<8x256xi32> to vector<8x256xf32>
    %29 = arith.addf %23, %28 : vector<8x256xf32>
    %30 = arith.truncf %29 : vector<8x256xf32> to vector<8x256xbf16>
    %c0_6 = arith.constant 0 : index
    %c0_7 = arith.constant 0 : index
    %31 = vector.load %arg3[%c0_6, %c0_7] : memref<256x128xbf16, #tpu.memory_space<vmem>>, vector<256x128xbf16>
    %cst_8 = arith.constant dense<0.000000e+00> : vector<8x128xf32>
    %32 = tpu.matmul %30, %31, %cst_8 {dimension_numbers = #tpu.dot_dimension_numbers<[1], [0], [0], [1], [0, 0, 1, 1], [], []>} : vector<8x256xbf16>, vector<256x128xbf16>, vector<8x128xf32> -> vector<8x128xf32>
    %33 = arith.addf %3, %32 : vector<8x128xf32>
    %c0_9 = arith.constant 0 : index
    %c0_10 = arith.constant 0 : index
    %34 = vector.load %arg5[%c0_9, %c0_10] : memref<1x128xf32, #tpu.memory_space<vmem>>, vector<1x128xf32>
    %35 = vector.broadcast %34 : vector<1x128xf32> to vector<8x128xf32>
    %36 = arith.addf %33, %35 : vector<8x128xf32>
    %c0_11 = arith.constant 0 : index
    %c0_12 = arith.constant 0 : index
    %37 = vector.load %arg6[%c0_11, %c0_12] : memref<8x128xf32, #tpu.memory_space<vmem>>, vector<8x128xf32>
    tpu.vector_store %arg6[%c0_11, %c0_12], %36 {strides = array<i32>} : memref<8x128xf32, #tpu.memory_space<vmem>>, vector<8x128xf32>,
    return
  }
  func.func @transform_0(%arg0: i32) -> (i32, i32) {
    %c0_i32 = arith.constant 0 : i32
    %c0_i32_0 = arith.constant 0 : i32
    return %arg0, %c0_i32 : i32, i32
  }
  func.func @transform_1(%arg0: i32) -> (i32, i32) {
    %c0_i32 = arith.constant 0 : i32
    %c0_i32_0 = arith.constant 0 : i32
    return %arg0, %c0_i32 : i32, i32
  }
  func.func @transform_2(%arg0: i32) -> (i32, i32) {
    %c0_i32 = arith.constant 0 : i32
    %c0_i32_0 = arith.constant 0 : i32
    %c0_i32_1 = arith.constant 0 : i32
    return %c0_i32, %c0_i32_0 : i32, i32
  }
  func.func @transform_3(%arg0: i32) -> (i32, i32) {
    %c0_i32 = arith.constant 0 : i32
    %c0_i32_0 = arith.constant 0 : i32
    %c0_i32_1 = arith.constant 0 : i32
    return %c0_i32, %c0_i32_0 : i32, i32
  }
  func.func @transform_4(%arg0: i32) -> (i32, i32) {
    %c0_i32 = arith.constant 0 : i32
    %c0_i32_0 = arith.constant 0 : i32
    %c0_i32_1 = arith.constant 0 : i32
    return %c0_i32, %c0_i32_0 : i32, i32
  }
  func.func @transform_5(%arg0: i32) -> (i32, i32) {
    %c0_i32 = arith.constant 0 : i32
    %c0_i32_0 = arith.constant 0 : i32
    return %arg0, %c0_i32 : i32, i32
  }
}

</mosaic_0001>

<bundles_post_ra>
// kernel: tpu_custom_call.1
= control target key start
LH: loop header
LB: loop body
LE: loop exit
PB: predicated region body
PF: predicated region fallthrough
CT: control target
= control target key end

     0   :  { %10 = vsyncpa [#allocation3], 0  ;;  %s646_s0 = inlined_call_operand.vmem [shape: s32[8,4], index: 0, kind: input, shape index: {}]   ;;  %s647_s1 = inlined_call_operand.vmem [shape: bf16[8,64], index: 1, kind: input, shape index: {}]   ;;  %s648_s2 = inlined_call_operand.hbm [shape: bf16[256,128], index: 2, kind: input, shape index: {}]   ;;  %s649_s3 = inlined_call_operand.hbm [shape: bf16[64,128], index: 3, kind: input, shape index: {}]   ;;  %s650_s4 = inlined_call_operand.vmem [shape: f32[1,128], index: 4, kind: input, shape index: {}]   ;;  %s651_s5 = inlined_call_operand.hbm [shape: f32[8,128], index: 5, kind: output, shape index: {}]  }
   0x1   :  { %11 = vsyncpa [#allocation6], 0 }
   0x2   :  { %12 = vsyncpa [#allocation4], 0  ;;  %s547_s18 = smov [#allocation2]   ;;  %s475_s22 = scalar_lea.hbm %s648_s2, 2048 }
   0x3   :  { %s22_s19 = sshll.u32 %s547_s18, 4  ;;  %p476_p0 = scmp.ne.s32.totalorder %s648_s2, %s475_s22  ;;  %s23_s19 = int_to_ptr.vmem [resolvable:$true] %s22_s19 }
   0x4   :  { %p479_p1 = scmp.lt.u32.totalorder %s475_s22, %s648_s2 }
   0x6   :  { %p481_p2 = pnand %p479_p1, %p476_p0 }
   0x8   :  { %484 = shalt.err (!%p481_p2)
}
   0x9   :  { %s485_s27 = scalar_lea.vmem %s23_s19, 2048  ;;  %p490_p4 = scmp.lt.s32.totalorder %s23_s19, %s23_s19 }
   0xa   :  { %p486_p3 = scmp.ne.s32.totalorder %s23_s19, %s485_s27  ;;  %p491_p5 = scmp.lt.s32.totalorder %s485_s27, %s485_s27 }
   0xc   :  { %p492_p6 = por %p491_p5, %p490_p4 }
   0xe   :  { %p493_p7 = pnand %p492_p6, %p486_p3 }
  0x10   :  { %496 = shalt.err (!%p493_p7)
}
  0x11   :  { %s548_s28 = smov 64   ;;  %s549_s29 = smov 4  }
  0x12   :  { %28 = dma.hbm_to_vmem [thread:$0]  %s648_s2, 2048, %s23_s19, [#allocation3], %s548_s28, %s548_s28, %s549_s29  }
  0x13   :  { %s550_s7 = smov [#allocation5]   ;;  %s497_s11 = scalar_lea.hbm %s649_s3, 512 }
  0x14   :  { %s34_s8 = sshll.u32 %s550_s7, 4  ;;  %p498_p8 = scmp.ne.s32.totalorder %s649_s3, %s497_s11  ;;  %s35_s8 = int_to_ptr.vmem [resolvable:$true] %s34_s8 }
  0x15   :  { %p501_p9 = scmp.lt.u32.totalorder %s497_s11, %s649_s3 }
  0x17   :  { %p503_p10 = pnand %p501_p9, %p498_p8 }
  0x19   :  { %506 = shalt.err (!%p503_p10)
}
  0x1a   :  { %s507_s16 = scalar_lea.vmem %s35_s8, 512  ;;  %p512_p12 = scmp.lt.s32.totalorder %s35_s8, %s35_s8 }
  0x1b   :  { %p508_p11 = scmp.ne.s32.totalorder %s35_s8, %s507_s16  ;;  %p513_p13 = scmp.lt.s32.totalorder %s507_s16, %s507_s16 }
  0x1d   :  { %p514_p0 = por %p513_p13, %p512_p12 }
  0x1f   :  { %p515_p1 = pnand %p514_p0, %p508_p11 }
  0x21   :  { %518 = shalt.err (!%p515_p1)
}
  0x22   :  { %40 = dma.hbm_to_vmem [thread:$0]  %s649_s3, 512, %s35_s8, [#allocation6], %s548_s28, %s548_s28, %s549_s29  }
  0x23   :  { %541 = dma.done.wait [#allocation3], 2048  }
  0x24   :  { %542 = vsyncadd [#allocation3], 4294965248 }
  0x25   :  { %543 = dma.done.wait [#allocation6], 512  }
  0x26   :  { %544 = vsyncadd [#allocation6], 4294966784  ;;  %v551_v0 = vmov 0   ;;  %v552_v1 = vmov 2   ;;  %v553_v2 = vmov 0.0   ;;  %v50_v3 = vld [vmem:[%s646_s0] sm:$0xff]  ;;  %v60_v27 = vlaneseq }
  0x27   :  { %450 = vset.pattern.permute.xlu0 %v551_v0  ;;  %452 = vset.pattern.permute.xlu1 %v552_v1  ;;  %v455_v4 = vld [vmem:[#allocation2 + $0x40] sm:$0xff]   ;;  %v457_v6 = vld [vmem:[#allocation2 + $0x48] sm:$0xff]   ;;  %v554_v8 = vmov 1   ;;  %v555_v9 = vmov 3   ;;  %v459_v10 = vld [vmem:[#allocation2 + $0x50] sm:$0xff]   ;;  %vm556_vm0 = vmmov 0  }
  0x28   :  { %427 = vmatprep.subr.bf16.mxu1 %v553_v2  ;;  %64 = vperm.xlu0 %450, %v50_v3   ;;  %v456_v5 = vld [vmem:[#allocation2] sm:$0xff]   ;;  %v458_v7 = vld [vmem:[#allocation2 + $0x8] sm:$0xff]   ;;  %v460_v11 = vld [vmem:[#allocation2 + $0x10] sm:$0xff]   ;;  %vm301_vm1 = vcmask 523264   ;;  %v61_v28 = vand.u32 127, %v60_v27  ;;  %s557_s21 = smov [#allocation7]  }
  0x29   :  { %86 = vperm.xlu1 %452, %v50_v3   ;;  %400 = vmatprep.subr.bf16.mxu0 %v455_v4  ;;  %v461_v12 = vld [vmem:[#allocation2 + $0x58] sm:$0xff]   ;;  %v465_v13 = vld [vmem:[#allocation5] sm:$0xff]   ;;  %v468_v16 = vld [vmem:[#allocation5 + $0x8] sm:$0xff]   ;;  %s360_s22 = sshll.u32 %s557_s21, 4  ;;  %s361_s22 = int_to_ptr.vmem [resolvable:$true] %s360_s22 }
  0x2a   :  { %401 = vmatpush3.bf16.msra.mxu0 %v456_v5  ;;  %v462_v14 = vld [vmem:[#allocation2 + $0x18] sm:$0xff]   ;;  %v463_v15 = vld [vmem:[#allocation2 + $0x60] sm:$0xff]   ;;  %428 = vmatpush3.bf16.msra.mxu1 %v465_v13  ;;  %v466_v18 = vld [vmem:[#allocation2 + $0x68] sm:$0xff]   ;;  %v62_v29 = vadd.s32 128, %v61_v28  ;;  %s519_s23 = scalar_lea.vmem %s361_s22, 128  ;;  %p524_p3 = scmp.lt.s32.totalorder %s361_s22, %s361_s22 }
  0x2b   :  { %402 = vmatprep.subr.bf16.mxu0 %v457_v6  ;;  %429 = vmatprep.subr.bf16.mxu1 %v553_v2  ;;  %v464_v17 = vld [vmem:[#allocation2 + $0x20] sm:$0xff]   ;;  %v471_v19 = vld [vmem:[#allocation5 + $0x10] sm:$0xff]   ;;  %v467_v20 = vld [vmem:[#allocation2 + $0x28] sm:$0xff]   ;;  %p520_p2 = scmp.ne.s32.totalorder %s361_s22, %s519_s23  ;;  %p525_p4 = scmp.lt.s32.totalorder %s519_s23, %s519_s23 }
  0x2c   :  { %451 = vset.pattern.permute.xlu0 %v554_v8  ;;  %435 = vmatprep.mubr.msk.bf16.mxu1 %vm556_vm0, %v553_v2  ;;  %v469_v21 = vld [vmem:[#allocation2 + $0x70] sm:$0xff]   ;;  %v474_v22 = vld [vmem:[#allocation5 + $0x18] sm:$0xff]   ;;  %v51_v25 = vld [vmem:[%s647_s1] sm:$0xf] }
  0x2d   :  { %453 = vset.pattern.permute.xlu1 %v555_v9  ;;  %75 = vperm.xlu0 %451, %v50_v3   ;;  %v470_v23 = vld [vmem:[#allocation2 + $0x30] sm:$0xff]   ;;  %v472_v24 = vld [vmem:[#allocation2 + $0x78] sm:$0xff]   ;;  %v399_v59 = vld [vmem:[%s650_s4] ss:$0 sm:$0xff]  ;;  %p526_p5 = por %p525_p4, %p524_p3 }
  0x2e   :  { %97 = vperm.xlu1 %453, %v50_v3   ;;  %403 = vmatpush3.bf16.msra.mxu0 %v458_v7  ;;  %v473_v26 = vld [vmem:[#allocation2 + $0x38] sm:$0xff]  }
  0x2f   :  { %404 = vmatprep.subr.bf16.mxu0 %v459_v10  ;;  %430 = vmatpush3.bf16.msra.mxu1 %v468_v16  ;;  %p527_p6 = pnand %p526_p5, %p520_p2 }
  0x30   :  { %431 = vmatprep.subr.bf16.mxu1 %v553_v2 }
  0x31   :  { %454 = vset.pattern.permute.xlu0 %v555_v9 }
  0x32   :  { %405 = vmatpush3.bf16.msra.mxu0 %v460_v11 }
  0x33   :  { %406 = vmatprep.subr.bf16.mxu0 %v461_v12  ;;  %432 = vmatpush3.bf16.msra.mxu1 %v471_v19 }
  0x34   :  { %433 = vmatprep.subr.bf16.mxu1 %v553_v2 }
  0x36   :  { %407 = vmatpush3.bf16.msra.mxu0 %v462_v14 }
  0x37   :  { %408 = vmatprep.subr.bf16.mxu0 %v463_v15  ;;  %434 = vmatpush3.bf16.msra.mxu1 %v474_v22 }
  0x3a   :  { %409 = vmatpush3.bf16.msra.mxu0 %v464_v17  ;;  %436 = vmatmul.mubr.msk.bf16.vlgmr.msra.gmra.mrb[0].mxu1 %vm301_vm1, %v51_v25 }
  0x3b   :  { %410 = vmatprep.subr.bf16.mxu0 %v466_v18 }
  0x3e   :  { %411 = vmatpush3.bf16.msra.mxu0 %v467_v20 }
  0x3f   :  { %412 = vmatprep.subr.bf16.mxu0 %v469_v21 }
  0x42   :  { %413 = vmatpush3.bf16.msra.mxu0 %v470_v23 }
  0x43   :  { %414 = vmatprep.subr.bf16.mxu0 %v472_v24 }
  0x46   :  { %415 = vmatpush3.bf16.msra.mxu0 %v473_v26 }
  0xa7   :  { %v65_v30 = vpop.permute.xlu0 %64 }
  0xa8   :  { %v87_v31 = vpop.permute.xlu1 %86  ;;  %vm66_vm2 = vcmp.eq.s32.totalorder %v65_v30, %v61_v28  ;;  %vm67_vm3 = vcmp.eq.s32.totalorder %v65_v30, %v62_v29 }
  0xa9   :  { %vm88_vm4 = vcmp.eq.s32.totalorder %v87_v31, %v61_v28  ;;  %vm89_vm5 = vcmp.eq.s32.totalorder %v87_v31, %v62_v29  ;;  %v370_v34 = vsel %vm66_vm2, 1.0, %v553_v2  ;;  %v371_v35 = vsel %vm67_vm3, 1.0, %v553_v2 }
  0xaa   :  { %v374_v40 = vsel %vm88_vm4, 1.0, %v553_v2  ;;  %v375_v41 = vsel %vm89_vm5, 1.0, %v553_v2 }
  0xac   :  { %v76_v32 = vpop.permute.xlu0 %75 }
  0xad   :  { %v98_v33 = vpop.permute.xlu1 %97  ;;  %vm77_vm6 = vcmp.eq.s32.totalorder %v76_v32, %v61_v28  ;;  %vm78_vm7 = vcmp.eq.s32.totalorder %v76_v32, %v62_v29 }
  0xae   :  { %vm99_vm8 = vcmp.eq.s32.totalorder %v98_v33, %v61_v28  ;;  %vm100_vm9 = vcmp.eq.s32.totalorder %v98_v33, %v62_v29  ;;  %v372_v36 = vsel %vm77_vm6, 1.0, %v553_v2  ;;  %v373_v37 = vsel %vm78_vm7, 1.0, %v553_v2 }
  0xaf   :  { %v83_v38 = vadd.f32 %v372_v36, %v370_v34  ;;  %v84_v39 = vadd.f32 %v373_v37, %v371_v35  ;;  %v376_v42 = vsel %vm99_vm8, 1.0, %v553_v2  ;;  %v377_v43 = vsel %vm100_vm9, 1.0, %v553_v2 }
  0xb1   :  { %v94_v44 = vadd.f32 %v374_v40, %v83_v38  ;;  %v95_v45 = vadd.f32 %v375_v41, %v84_v39 }
  0xb3   :  { %v105_v46 = vadd.f32 %v376_v42, %v94_v44  ;;  %v106_v47 = vadd.f32 %v377_v43, %v95_v45 }
  0xb5   :  { %v107_v48 = vpack.c.bf16 %v105_v46, %v105_v46  ;;  %v108_v49 = vpack.c.bf16 %v106_v47, %v106_v47 }
  0xb7   :  { %269 = vmatprep.mubr.bf16.mxu0 %v108_v49 }
  0xb8   :  { %270 = vmatmul.mubr.bf16.vlgmr.msra.gmra.mrb[0].mxu0 %v107_v48 }
 0x10d   :  { %v339_v50 = vpop.f32.mrb[0].mxu1 }
 0x10e   :  { %v437_v51 = vpop.f32.mrb[1].mxu1 }
 0x10f   :  { %v342_v52 = vpop.f32.mrb[2].mxu1 }
 0x110   :  { %v438_v53 = vpop.f32.mrb[3].mxu1 }
 0x18b   :  { %v416_v54 = vpop.f32.mrb[0].mxu0 }
 0x18c   :  { %v417_v55 = vpop.f32.mrb[1].mxu0 }
 0x18d   :  { %v418_v56 = vadd.f32 %v417_v55, %v416_v54  ;;  %v419_v57 = vpop.f32.mrb[2].mxu0 }
 0x18e   :  { %v420_v58 = vpop.f32.mrb[3].mxu0 }
 0x18f   :  { %v340_v60 = vadd.f32 %v418_v56, %v339_v50 }
 0x191   :  { %v352_v61 = vadd.f32 %v399_v59, %v340_v60 }
 0x193   :  { %353 = vst [vmem:[#allocation7] sm:$0xff] %v352_v61 }
 0x194   :  { %530 = shalt.err (!%p527_p6)
}
 0x195   :  { %s531_s26 = scalar_lea.hbm %s651_s5, 128 }
 0x196   :  { %p532_p7 = scmp.ne.s32.totalorder %s651_s5, %s531_s26  ;;  %p535_p8 = scmp.lt.u32.totalorder %s531_s26, %s651_s5 }
 0x198   :  { %p537_p9 = pnand %p535_p8, %p532_p7 }
 0x19a   :  { %540 = shalt.err (!%p537_p9)
}
 0x19b   :  { %363 = dma.vmem_to_hbm [thread:$0]  %s361_s22, 128, %s651_s5, [#allocation4]  }
 0x19c   :  { %545 = dma.done.wait [#allocation4], 128  }
 0x19d   :  { %546 = vsyncadd [#allocation4], 4294967168 }
 0x19e   :  { %367 = vsyncpa [#allocation3], 1 }
 0x19f   :  { %368 = vsyncpa [#allocation6], 1 }
 0x1a0   :  { %369 = vsyncpa [#allocation4], 1 }

</bundles_post_ra>
